<compile_context>
chip_gen: v5e
topology: v5e:2x2
jax: 0.10.0
libtpu: 0.0.40
codegen_flags: <defaults>
</compile_context>

<pallas_src>
from functools import partial

import jax
import jax.numpy as jnp
from jax.experimental import pallas as pl
from jax.experimental.pallas import tpu as pltpu


def graphsage_fwd_kernel(comb_ref, wenc_ref, wcls_ref, out_ref, *, chunk):
    # comb_ref: (2*feat_dim, TN)        bf16  combined (self || mean-neighbor) feats
    # wenc_ref: (embed_dim, 2*feat_dim) bf16  encoder weight (tile-resident)
    # wcls_ref: (num_classes, embed_dim) f32  SupervisedGraphSage classifier weight
    # out_ref : (num_classes, TN)       f32   scores (lane-dense along nodes)
    wenc = wenc_ref[...]
    wcls = wcls_ref[...]
    n_chunks = comb_ref.shape[1] // chunk  # static

    @pl.loop(0, n_chunks)
    def _(c):
        j = pl.multiple_of(c * chunk, chunk)
        comb = comb_ref[:, pl.ds(j, chunk)]                      # bf16 (2F, chunk)
        # Encoder matmul + ReLU (as in the reference Encoder), f32 accumulation.
        embeds = jnp.maximum(
            jnp.dot(wenc, comb, preferred_element_type=jnp.float32), 0.0
        )                                                        # f32 (E, chunk)
        # Classifier matmul in f32 (tiny FLOP share; avoids the bf16 recast).
        out_ref[:, pl.ds(j, chunk)] = jnp.dot(
            wcls, embeds, preferred_element_type=jnp.float32
        )


def supervised_graphsage_forward(combined_t, w_enc, w_cls, *, tn=8192, chunk=512):
    """combined_t: (2*feat_dim, num_nodes) -> scores.t(): (num_nodes, num_classes) f32.

    combined_t should ideally already be bf16 (it is cast here only if not).
    """
    two_fd, n = combined_t.shape
    embed_dim = w_enc.shape[0]
    num_classes = w_cls.shape[0]

    # Adaptive node tile: never larger than the 128-rounded batch, and (when large)
    # a whole number of in-kernel compute chunks.
    n_round = ((n + 127) // 128) * 128
    tn = min(tn, n_round)
    if tn > chunk:
        tn = (tn // chunk) * chunk
        inner = chunk
    else:
        inner = tn  # single in-kernel chunk for small batches

    # Zero-padding the node axis is numerically safe ONLY because neither matmul has a
    # bias: relu(W @ 0) = 0 and Wcls @ 0 = 0; padded columns are sliced off below.
    n_pad = ((n + tn - 1) // tn) * tn
    comb_bf = combined_t if combined_t.dtype == jnp.bfloat16 else combined_t.astype(jnp.bfloat16)
    if n_pad != n:
        comb_bf = jnp.pad(comb_bf, ((0, 0), (0, n_pad - n)))

    wenc_bf = w_enc.astype(jnp.bfloat16)       # 64 KiB, tile-resident
    wcls_f32 = w_cls.astype(jnp.float32)       # tiny; stays f32

    flops = 2 * n_pad * (two_fd * embed_dim + embed_dim * num_classes)
    bytes_accessed = (
        2 * two_fd * n_pad                     # bf16 comb read (dominant stream)
        + 2 * embed_dim * two_fd               # bf16 encoder weight
        + 4 * num_classes * embed_dim          # f32 classifier weight
        + 4 * num_classes * n_pad              # f32 scores write
    )

    scores = pl.pallas_call(
        partial(graphsage_fwd_kernel, chunk=inner),
        out_shape=jax.ShapeDtypeStruct((num_classes, n_pad), jnp.float32),
        grid=(n_pad // tn,),
        in_specs=[
            pl.BlockSpec((two_fd, tn), lambda i: (0, i)),            # node-tiled stream
            pl.BlockSpec((embed_dim, two_fd), lambda i: (0, 0)),     # resident weight
            pl.BlockSpec((num_classes, embed_dim), lambda i: (0, 0)),
        ],
        out_specs=pl.BlockSpec((num_classes, tn), lambda i: (0, i)),
        compiler_params=pltpu.CompilerParams(dimension_semantics=("parallel",)),
        cost_estimate=pl.CostEstimate(
            flops=flops, transcendentals=0, bytes_accessed=bytes_accessed
        ),
    )(comb_bf, wenc_bf, wcls_f32)

    # forward() returns scores.t() = (num_nodes, num_classes); the transpose here is
    # tiny (n x num_classes) and keeps the kernel's store path lane-dense.
    return scores[:, :n].T


def xavier_uniform(key, shape):
    fan_out, fan_in = shape
    bound = (6.0 / (fan_in + fan_out)) ** 0.5
    return jax.random.uniform(key, shape, jnp.float32, -bound, bound)


if __name__ == "__main__":
    key = jax.random.PRNGKey(0)
    feat_dim = 64
    embed_dim = 128
    num_classes = 8
    num_all_nodes = 128
    batch = 64

    k1, k2, k3, k4, k5 = jax.random.split(key, 5)

    # Synthetic graph data (deterministic).
    features = jax.random.normal(k1, (num_all_nodes, feat_dim), jnp.float32)
    adj = (jax.random.uniform(k2, (num_all_nodes, num_all_nodes)) < 0.1).astype(jnp.float32)
    adj = jnp.maximum(adj, jnp.eye(num_all_nodes, dtype=jnp.float32))  # avoid zero degree
    nodes = jax.random.randint(k3, (batch,), 0, num_all_nodes)

    # Parameters (xavier_uniform as in the module's __init__).
    w_enc = xavier_uniform(k4, (embed_dim, 2 * feat_dim))      # Encoder weight
    w_cls = xavier_uniform(k5, (num_classes, embed_dim))       # SupervisedGraphSage.weight

    # Encoder glue in plain JAX, built feature-major (column-per-node) and emitted
    # directly in bf16 so the dominant stream is materialized exactly once before the
    # kernel (no extra f32 pad/cast pass).
    # TODO(synk): the real `enc` (Encoder/MeanAggregator with sparse neighbor sampling)
    # is external to SupervisedGraphSage; a dense mean-aggregation stand-in is used.
    features_t = features.T                                     # (feat_dim, num_all_nodes)
    a = adj[nodes]                                              # (batch, num_all_nodes)
    deg = jnp.maximum(a.sum(-1), 1.0)                           # (batch,)
    self_feats_t = features_t[:, nodes]                         # (feat_dim, batch)
    neigh_feats_t = (features_t @ a.T) / deg[None, :]           # (feat_dim, batch)
    combined_f32 = jnp.concatenate([self_feats_t, neigh_feats_t], axis=0)  # (2F, batch)
    combined_bf16 = combined_f32.astype(jnp.bfloat16)           # kernel input, bf16

    # Fused Pallas kernel: encoder matmul + relu + classifier matmul.
    scores = supervised_graphsage_forward(combined_bf16, w_enc, w_cls)
    jax.block_until_ready(scores)
    assert scores.shape == (batch, num_classes)
    assert scores.dtype == jnp.float32

    # Reference (f32) check; bf16 operands give ~1e-2 relative drift.
    embeds_ref = jnp.maximum(w_enc @ combined_f32, 0.0)
    scores_ref = (w_cls @ embeds_ref).T
    err = jnp.max(jnp.abs(scores - scores_ref)) / (jnp.max(jnp.abs(scores_ref)) + 1e-6)
    assert float(err) < 5e-2, f"relative error too large: {float(err)}"

    print("KERNEL_OK")
</pallas_src>

<mosaic_0001>
module attributes {stable_mosaic.version = 11 : i64} {
  func.func @graphsage_fwd_kernel(%arg0: i32, %arg1: memref<128x128xbf16, #tpu.memory_space<vmem>>, %arg2: memref<128x128xbf16, #tpu.memory_space<vmem>>, %arg3: memref<8x128xf32, #tpu.memory_space<vmem>>, %arg4: memref<8x128xf32, #tpu.memory_space<vmem>>) attributes {dimension_semantics = [#tpu.dimension_semantics<parallel>], iteration_bounds = array<i64: 1>, scalar_prefetch = 0 : i64, scratch_operands = 0 : i64, tpu.core_type = #tpu.core_type<tc>, window_params = [{transform_indices = @transform_0, window_bounds = array<i64: 128, 128>}, {pipeline_mode = #tpu.pipeline_mode<synchronous>, transform_indices = @transform_1, window_bounds = array<i64: 128, 128>}, {pipeline_mode = #tpu.pipeline_mode<synchronous>, transform_indices = @transform_2, window_bounds = array<i64: 8, 128>}, {transform_indices = @transform_3, window_bounds = array<i64: 8, 128>}]} {
    %c0 = arith.constant 0 : index
    %c0_0 = arith.constant 0 : index
    %0 = vector.load %arg2[%c0, %c0_0] : memref<128x128xbf16, #tpu.memory_space<vmem>>, vector<128x128xbf16>
    %c0_1 = arith.constant 0 : index
    %c0_2 = arith.constant 0 : index
    %1 = vector.load %arg3[%c0_1, %c0_2] : memref<8x128xf32, #tpu.memory_space<vmem>>, vector<8x128xf32>
    %c0_i32 = arith.constant 0 : i32
    %c1_i32 = arith.constant 1 : i32
    %2 = arith.muli %c0_i32, %c1_i32 : i32
    %c0_i32_3 = arith.constant 0 : i32
    %3 = arith.addi %c0_i32_3, %2 : i32
    %c128_i32 = arith.constant 128 : i32
    %4 = arith.muli %3, %c128_i32 : i32
    %5 = tpu.assume_multiple %4, 128 : i32
    %c0_4 = arith.constant 0 : index
    %6 = arith.index_cast %5 : i32 to index
    %7 = vector.load %arg1[%c0_4, %6] : memref<128x128xbf16, #tpu.memory_space<vmem>>, vector<128x128xbf16>
    %cst = arith.constant dense<0.000000e+00> : vector<128x128xf32>
    %8 = tpu.matmul %0, %7, %cst {dimension_numbers = #tpu.dot_dimension_numbers<[1], [0], [0], [1], [0, 0, 1, 1], [], []>} : vector<128x128xbf16>, vector<128x128xbf16>, vector<128x128xf32> -> vector<128x128xf32>
    %cst_5 = arith.constant 0.000000e+00 : f32
    %9 = vector.broadcast %cst_5 : f32 to vector<128x128xf32>
    %10 = arith.maximumf %8, %9 : vector<128x128xf32>
    %cst_6 = arith.constant dense<0.000000e+00> : vector<8x128xf32>
    %11 = tpu.matmul %1, %10, %cst_6 {dimension_numbers = #tpu.dot_dimension_numbers<[1], [0], [0], [1], [0, 0, 1, 1], [], []>} : vector<8x128xf32>, vector<128x128xf32>, vector<8x128xf32> -> vector<8x128xf32>
    %c0_7 = arith.constant 0 : index
    %12 = arith.index_cast %5 : i32 to index
    %13 = vector.load %arg4[%c0_7, %12] : memref<8x128xf32, #tpu.memory_space<vmem>>, vector<8x128xf32>
    tpu.vector_store %arg4[%c0_7, %12], %11 {strides = array<i32>} : memref<8x128xf32, #tpu.memory_space<vmem>>, vector<8x128xf32>,
    %c1_i32_8 = arith.constant 1 : i32
    return
  }
  func.func @transform_0(%arg0: i32) -> (i32, i32) {
    %c0_i32 = arith.constant 0 : i32
    %c0_i32_0 = arith.constant 0 : i32
    return %c0_i32, %arg0 : i32, i32
  }
  func.func @transform_1(%arg0: i32) -> (i32, i32) {
    %c0_i32 = arith.constant 0 : i32
    %c0_i32_0 = arith.constant 0 : i32
    %c0_i32_1 = arith.constant 0 : i32
    return %c0_i32, %c0_i32_0 : i32, i32
  }
  func.func @transform_2(%arg0: i32) -> (i32, i32) {
    %c0_i32 = arith.constant 0 : i32
    %c0_i32_0 = arith.constant 0 : i32
    %c0_i32_1 = arith.constant 0 : i32
    return %c0_i32, %c0_i32_0 : i32, i32
  }
  func.func @transform_3(%arg0: i32) -> (i32, i32) {
    %c0_i32 = arith.constant 0 : i32
    %c0_i32_0 = arith.constant 0 : i32
    return %c0_i32, %arg0 : i32, i32
  }
}

</mosaic_0001>

<bundles_post_ra>
// kernel: tpu_custom_call.1
= control target key start
LH: loop header
LB: loop body
LE: loop exit
PB: predicated region body
PF: predicated region fallthrough
CT: control target
= control target key end

     0   :  { %8 = vsyncpa [#allocation3], 0  ;;  %s543_s0 = inlined_call_operand.hbm [shape: bf16[128,128], index: 0, kind: input, shape index: {}]   ;;  %s544_s1 = inlined_call_operand.hbm [shape: bf16[128,128], index: 1, kind: input, shape index: {}]   ;;  %s545_s2 = inlined_call_operand.hbm [shape: f32[8,128], index: 2, kind: input, shape index: {}]   ;;  %s546_s3 = inlined_call_operand.hbm [shape: f32[8,128], index: 3, kind: output, shape index: {}]  }
   0x1   :  { %9 = vsyncpa [#allocation6], 0 }
   0x2   :  { %10 = vsyncpa [#allocation4], 0  ;;  %s28_s14 = sshll.u32 %s544_s1, 4  ;;  %s505_s15 = smov [#allocation5]   ;;  %s29_s14 = int_to_ptr.hbm [resolvable:$true] %s28_s14 }
   0x3   :  { %s30_s16 = sshll.u32 %s505_s15, 4  ;;  %s15_s19 = sshll.u32 %s543_s0, 4  ;;  %s31_s16 = int_to_ptr.vmem [resolvable:$true] %s30_s16  ;;  %s16_s19 = int_to_ptr.hbm [resolvable:$true] %s15_s19 }
   0x4   :  { %s506_s20 = smov 64   ;;  %s507_s21 = smov 4  }
   0x5   :  { %36 = dma.hbm_to_vmem [thread:$0]  %s29_s14, 1024, %s31_s16, [#allocation6], %s506_s20, %s506_s20, %s507_s21  }
   0x6   :  { %s508_s22 = smov [#allocation2]   ;;  %s42_s26 = sshll.u32 %s545_s2, 4  ;;  %s43_s26 = int_to_ptr.hbm [resolvable:$true] %s42_s26 }
   0x7   :  { %s17_s23 = sshll.u32 %s508_s22, 4  ;;  %s509_s1 = smov [#allocation7]   ;;  %s18_s23 = int_to_ptr.vmem [resolvable:$true] %s17_s23 }
   0x8   :  { %23 = dma.hbm_to_vmem [thread:$0]  %s16_s19, 1024, %s18_s23, [#allocation3], %s506_s20, %s506_s20, %s507_s21  }
   0x9   :  { %s44_s27 = sshll.u32 %s509_s1, 4  ;;  %s45_s27 = int_to_ptr.vmem [resolvable:$true] %s44_s27 }
   0xa   :  { %47 = dma.hbm_to_vmem [thread:$0]  %s43_s26, 128, %s45_s27, [#allocation6]  }
   0xb   :  { %499 = dma.done.wait [#allocation3], 1024  }
   0xc   :  { %500 = vsyncadd [#allocation3], 4294966272 }
   0xd   :  { %501 = dma.done.wait [#allocation6], 1152  }
   0xe   :  { %502 = vsyncadd [#allocation6], 4294966144  ;;  %v372_v0 = vld [vmem:[#allocation2 + $0x38] sm:$0xff]  ;;  %v371_v1 = vld [vmem:[#allocation2 + $0x30] sm:$0xff]  ;;  %s510_s0 = smov [#allocation8]   ;;  %s282_s30 = sshll.u32 %s546_s3, 4  ;;  %s283_s30 = int_to_ptr.hbm [resolvable:$true] %s282_s30 }
   0xf   :  { %375 = vmatpush.bf16.msra.mxu3 %v372_v0  ;;  %373 = vmatpush.bf16.msra.mxu1 %v372_v0  ;;  %v370_v2 = vld [vmem:[#allocation2 + $0x28] sm:$0xff]  ;;  %v369_v3 = vld [vmem:[#allocation2 + $0x20] sm:$0xff]  ;;  %v368_v4 = vld [vmem:[#allocation2 + $0x18] sm:$0xff]  ;;  %s280_s2 = sshll.u32 %s510_s0, 4  ;;  %s281_s2 = int_to_ptr.vmem [resolvable:$true] %s280_s2 }
  0x10   :  { %374 = vmatpush.bf16.msra.mxu2 %v372_v0  ;;  %189 = vmatpush.bf16.msra.mxu0 %v372_v0  ;;  %v367_v5 = vld [vmem:[#allocation2 + $0x10] sm:$0xff]  ;;  %v366_v6 = vld [vmem:[#allocation2 + $0x8] sm:$0xff]  ;;  %v365_v7 = vld [vmem:[#allocation2] sm:$0xff] }
  0x11   :  { %v362_v8 = vld [vmem:[#allocation5 + $0x28] sm:$0xff]  ;;  %v359_v9 = vld [vmem:[#allocation5 + $0x10] sm:$0xff]  ;;  %v361_v10 = vld [vmem:[#allocation5 + $0x20] sm:$0xff] }
  0x12   :  { %v357_v11 = vld [vmem:[#allocation5] sm:$0xff]  ;;  %v363_v12 = vld [vmem:[#allocation5 + $0x30] sm:$0xff]  ;;  %v360_v13 = vld [vmem:[#allocation5 + $0x18] sm:$0xff] }
  0x13   :  { %378 = vmatpush.bf16.msra.mxu3 %v371_v1  ;;  %376 = vmatpush.bf16.msra.mxu1 %v371_v1  ;;  %v358_v14 = vld [vmem:[#allocation5 + $0x8] sm:$0xff]  ;;  %v364_v15 = vld [vmem:[#allocation5 + $0x38] sm:$0xff]  ;;  %v76_v48 = vld [vmem:[#allocation7] sm:$0xff] }
  0x14   :  { %377 = vmatpush.bf16.msra.mxu2 %v371_v1  ;;  %190 = vmatpush.bf16.msra.mxu0 %v371_v1 }
  0x17   :  { %381 = vmatpush.bf16.msra.mxu3 %v370_v2  ;;  %379 = vmatpush.bf16.msra.mxu1 %v370_v2 }
  0x18   :  { %380 = vmatpush.bf16.msra.mxu2 %v370_v2  ;;  %191 = vmatpush.bf16.msra.mxu0 %v370_v2 }
  0x1b   :  { %384 = vmatpush.bf16.msra.mxu3 %v369_v3  ;;  %382 = vmatpush.bf16.msra.mxu1 %v369_v3 }
  0x1c   :  { %383 = vmatpush.bf16.msra.mxu2 %v369_v3  ;;  %192 = vmatpush.bf16.msra.mxu0 %v369_v3 }
  0x1f   :  { %387 = vmatpush.bf16.msra.mxu3 %v368_v4  ;;  %385 = vmatpush.bf16.msra.mxu1 %v368_v4 }
  0x20   :  { %386 = vmatpush.bf16.msra.mxu2 %v368_v4  ;;  %193 = vmatpush.bf16.msra.mxu0 %v368_v4 }
  0x23   :  { %390 = vmatpush.bf16.msra.mxu3 %v367_v5  ;;  %388 = vmatpush.bf16.msra.mxu1 %v367_v5 }
  0x24   :  { %389 = vmatpush.bf16.msra.mxu2 %v367_v5  ;;  %194 = vmatpush.bf16.msra.mxu0 %v367_v5 }
  0x27   :  { %393 = vmatpush.bf16.msra.mxu3 %v366_v6  ;;  %391 = vmatpush.bf16.msra.mxu1 %v366_v6 }
  0x28   :  { %392 = vmatpush.bf16.msra.mxu2 %v366_v6  ;;  %195 = vmatpush.bf16.msra.mxu0 %v366_v6 }
  0x2b   :  { %396 = vmatpush.bf16.msra.mxu3 %v365_v7  ;;  %394 = vmatpush.bf16.msra.mxu1 %v365_v7 }
  0x2c   :  { %395 = vmatpush.bf16.msra.mxu2 %v365_v7  ;;  %196 = vmatpush.bf16.msra.mxu0 %v365_v7 }
  0x2e   :  { %222 = vmatmul.bf16.vlgmr.msra.gmra.mxu3 %v362_v8  ;;  %207 = vmatmul.bf16.vlgmr.msra.gmra.mxu1 %v359_v9 }
  0x2f   :  { %217 = vmatmul.bf16.vlgmr.msra.gmra.mxu2 %v361_v10  ;;  %197 = vmatmul.bf16.vlgmr.msra.gmra.mxu0 %v357_v11 }
  0x3e   :  { %227 = vmatmul.bf16.gmra.mxu3 %v363_v12  ;;  %212 = vmatmul.bf16.gmra.mxu1 %v360_v13 }
  0x3f   :  { %202 = vmatmul.bf16.gmra.mxu0 %v358_v14 }
  0x4e   :  { %232 = vmatmul.bf16.gmra.mxu3 %v364_v15 }
  0xab   :  { %v208_v19 = vpop.f32.mrf.mxu1 }
  0xac   :  { %v198_v21 = vpop.f32.mrf.mxu0  ;;  %v242_v43 = vmax.f32 %v208_v19, 0.0 }
  0xad   :  { %v238_v47 = vmax.f32 %v198_v21, 0.0 }
  0xb1   :  { %v223_v16 = vpop.f32.mrf.mxu3 }
  0xb2   :  { %v218_v24 = vpop.f32.mrf.mxu2  ;;  %v248_v34 = vmax.f32 %v223_v16, 0.0 }
  0xb3   :  { %v210_v23 = vpop.f32.mrf.mxu1  ;;  %v246_v38 = vmax.f32 %v218_v24, 0.0 }
  0xb4   :  { %v200_v27 = vpop.f32.mrf.mxu0  ;;  %v243_v41 = vmax.f32 %v210_v23, 0.0 }
  0xb5   :  { %v239_v46 = vmax.f32 %v200_v27, 0.0 }
  0xb9   :  { %v225_v17 = vpop.f32.mrf.mxu3 }
  0xba   :  { %v249_v32 = vmax.f32 %v225_v17, 0.0  ;;  %v220_v33 = vpop.f32.mrf.mxu2 }
  0xbb   :  { %v213_v29 = vpop.f32.mrf.mxu1  ;;  %v247_v36 = vmax.f32 %v220_v33, 0.0 }
  0xbc   :  { %v203_v35 = vpop.f32.mrf.mxu0  ;;  %v244_v40 = vmax.f32 %v213_v29, 0.0 }
  0xbd   :  { %v240_v45 = vmax.f32 %v203_v35, 0.0 }
  0xc1   :  { %v228_v18 = vpop.f32.mrf.mxu3 }
  0xc2   :  { %v250_v31 = vmax.f32 %v228_v18, 0.0 }
  0xc3   :  { %v215_v37 = vpop.f32.mrf.mxu1 }
  0xc4   :  { %v245_v39 = vmax.f32 %v215_v37, 0.0  ;;  %v205_v42 = vpop.f32.mrf.mxu0 }
  0xc5   :  { %v241_v44 = vmax.f32 %v205_v42, 0.0 }
  0xc9   :  { %v230_v20 = vpop.f32.mrf.mxu3 }
  0xca   :  { %v251_v30 = vmax.f32 %v230_v20, 0.0 }
  0xd1   :  { %v233_v22 = vpop.f32.mrf.mxu3 }
  0xd2   :  { %v252_v28 = vmax.f32 %v233_v22, 0.0 }
  0xd9   :  { %v235_v25 = vpop.f32.mrf.mxu3 }
  0xda   :  { %v253_v26 = vmax.f32 %v235_v25, 0.0 }
  0xdc   :  { %254 = vmatpush.msrb.mxu1 %v253_v26 }
  0xde   :  { %255 = vmatpush.msrb.mxu1 %v252_v28 }
  0xe0   :  { %256 = vmatpush.msrb.mxu1 %v251_v30 }
  0xe2   :  { %257 = vmatpush.msrb.mxu1 %v250_v31 }
  0xe4   :  { %258 = vmatpush.msrb.mxu1 %v249_v32 }
  0xe6   :  { %259 = vmatpush.msrb.mxu1 %v248_v34 }
  0xe8   :  { %260 = vmatpush.msrb.mxu1 %v247_v36 }
  0xea   :  { %261 = vmatpush.msrb.mxu1 %v246_v38 }
  0xec   :  { %262 = vmatpush.msrb.mxu1 %v245_v39 }
  0xee   :  { %263 = vmatpush.msrb.mxu1 %v244_v40 }
  0xf0   :  { %264 = vmatpush.msrb.mxu1 %v243_v41 }
  0xf2   :  { %265 = vmatpush.msrb.mxu1 %v242_v43 }
  0xf4   :  { %266 = vmatpush.msrb.mxu1 %v241_v44 }
  0xf6   :  { %267 = vmatpush.msrb.mxu1 %v240_v45 }
  0xf8   :  { %268 = vmatpush.msrb.mxu1 %v239_v46 }
  0xfa   :  { %269 = vmatpush.msrb.mxu1 %v238_v47 }
  0xfb   :  { %270 = vmatmul.f32.vlgmr.msrb.gmra.mxu1 %v76_v48 }
 0x178   :  { %v271_v49 = vpop.f32.mrf.mxu1 }
 0x179   :  { %274 = vst [vmem:[#allocation8] sm:$0xff] %v271_v49 }
 0x17a   :  { %285 = dma.vmem_to_hbm [thread:$0]  %s281_s2, 128, %s283_s30, [#allocation4]  }
 0x17b   :  { %503 = dma.done.wait [#allocation4], 128  }
 0x17c   :  { %504 = vsyncadd [#allocation4], 4294967168 }
 0x17d   :  { %290 = vsyncpa [#allocation3], 1 }
 0x17e   :  { %291 = vsyncpa [#allocation6], 1 }
 0x17f   :  { %292 = vsyncpa [#allocation4], 1 }

</bundles_post_ra>
